<compile_context>
chip_gen: v5e
topology: v5e:2x2
jax: 0.10.0
libtpu: 0.0.40
codegen_flags: <defaults>
</compile_context>

<pallas_src>
import jax
import jax.numpy as jnp
from jax.experimental import pallas as pl
from jax.experimental.pallas import tpu as pltpu

LANE = 128          # TPU lane width (last-dim vreg width)
SUBLANE = 8         # f32 sublane width
MAX_TB = 1024       # batch-tile rows (amortizes ~0.35 us/step pipeline overhead)
NEG_BIG = -1e30     # finite "-inf" used to mask padded logit lanes (f32-safe)


def _round_up(n, m):
    return ((n + m - 1) // m) * m


def residual_mlp_kernel(x_ref, w_in_ref, b_in_ref,
                        wb1_ref, bb1_ref,
                        wb2_ref, bb2_ref,
                        w_out_ref, b_out_ref,
                        o_ref):
    # x and all weights arrive as bf16 (cast + padded in the wrapper);
    # MXU accumulates in f32 and the elementwise/softmax chain stays f32.
    x = x_ref[...]

    # input_layer: Linear(D_in -> H), no activation afterwards
    h = jnp.dot(x, w_in_ref[...], preferred_element_type=jnp.float32) + b_in_ref[...]

    # ResidualBlock 1: relu(h + relu(Linear(h)))
    t = jnp.dot(h.astype(jnp.bfloat16), wb1_ref[...],
                preferred_element_type=jnp.float32) + bb1_ref[...]
    h = jnp.maximum(h + jnp.maximum(t, 0.0), 0.0)

    # ResidualBlock 2: relu(h + relu(Linear(h)))
    t = jnp.dot(h.astype(jnp.bfloat16), wb2_ref[...],
                preferred_element_type=jnp.float32) + bb2_ref[...]
    h = jnp.maximum(h + jnp.maximum(t, 0.0), 0.0)

    # output_layer: Linear(H -> D_out).  b_out's padded lanes hold NEG_BIG,
    # so padded logits are already masked (no iota/where needed).
    logits = jnp.dot(h.astype(jnp.bfloat16), w_out_ref[...],
                     preferred_element_type=jnp.float32) + b_out_ref[...]

    # Numerically stable softmax; exact reciprocal keeps row sums == 1.
    m = jnp.max(logits, axis=1, keepdims=True)
    e = jnp.exp(logits - m)
    denom = jnp.sum(e, axis=1, keepdims=True)
    o_ref[...] = e * pl.reciprocal(denom, approx=False)


def residual_mlp(x, params):
    """Run the ResidualMLP forward pass through a single Pallas kernel.

    Weights are (in, out), biases (1, out), all f32.  Feature dims are padded
    to the 128-lane width (weights/x cast to bf16 while padding); the batch is
    tiled directly (no batch padding).  Output is sliced back to (B, D_out)."""
    B, d_in = x.shape
    h_dim = params["w_in"].shape[1]
    d_out = params["w_out"].shape[1]

    d_in_p = _round_up(d_in, LANE)
    h_p = _round_up(h_dim, LANE)
    d_out_p = _round_up(d_out, LANE)

    # Batch tile: at least 2 grid steps when B allows it (v7x megacore),
    # multiple of the sublane width, capped at MAX_TB.
    if B <= SUBLANE:
        tb = B
    else:
        tb = min(MAX_TB, _round_up(-(-B // 2), SUBLANE))
    grid = (pl.cdiv(B, tb),)

    def pad2(a, rows, cols, dtype, fill=0.0):
        a = a.astype(dtype)
        return jnp.pad(a, ((0, rows - a.shape[0]), (0, cols - a.shape[1])),
                       constant_values=fill)

    # Streamed activation: bf16, lane-padded only (no batch padding).
    x_p = jnp.pad(x.astype(jnp.bfloat16), ((0, 0), (0, d_in_p - d_in)))

    # VMEM-resident weights in bf16 (halves DMA + residency), biases in f32.
    w_in = pad2(params["w_in"], d_in_p, h_p, jnp.bfloat16)
    b_in = pad2(params["b_in"], 1, h_p, jnp.float32)
    wb1 = pad2(params["wb1"], h_p, h_p, jnp.bfloat16)
    bb1 = pad2(params["bb1"], 1, h_p, jnp.float32)
    wb2 = pad2(params["wb2"], h_p, h_p, jnp.bfloat16)
    bb2 = pad2(params["bb2"], 1, h_p, jnp.float32)
    w_out = pad2(params["w_out"], h_p, d_out_p, jnp.bfloat16)
    # Padded logit lanes get NEG_BIG via the bias add -> masked softmax lanes.
    b_out = pad2(params["b_out"], 1, d_out_p, jnp.float32, fill=NEG_BIG)

    def resident(shape):
        # Same block every grid step -> stays VMEM-resident (no re-DMA).
        return pl.BlockSpec(shape, lambda i: (0, 0))

    out = pl.pallas_call(
        residual_mlp_kernel,
        out_shape=jax.ShapeDtypeStruct((B, d_out_p), jnp.float32),
        grid=grid,
        in_specs=[
            pl.BlockSpec((tb, d_in_p), lambda i: (i, 0)),      # x tile (batch grid)
            resident((d_in_p, h_p)), resident((1, h_p)),       # input layer
            resident((h_p, h_p)), resident((1, h_p)),          # residual block 1
            resident((h_p, h_p)), resident((1, h_p)),          # residual block 2
            resident((h_p, d_out_p)), resident((1, d_out_p)),  # output layer
        ],
        out_specs=pl.BlockSpec((tb, d_out_p), lambda i: (i, 0)),
        compiler_params=pltpu.CompilerParams(
            dimension_semantics=("parallel",)),
    )(x_p, w_in, b_in, wb1, bb1, wb2, bb2, w_out, b_out)

    return out[:, :d_out]


def init_params(key, layer_sizes):
    """Deterministic PyTorch-style Linear init (U[-1/sqrt(fan_in), 1/sqrt(fan_in)]).

    Weights are returned already transposed to (in, out), biases as (1, out)."""
    d_in, h, d_out = layer_sizes[0], layer_sizes[1], layer_sizes[-1]

    def linear(k, fan_in, fan_out):
        kw, kb = jax.random.split(k)
        bound = 1.0 / jnp.sqrt(fan_in)
        w = jax.random.uniform(kw, (fan_in, fan_out), jnp.float32, -bound, bound)
        b = jax.random.uniform(kb, (1, fan_out), jnp.float32, -bound, bound)
        return w, b

    k0, k1, k2, k3 = jax.random.split(key, 4)
    w_in, b_in = linear(k0, d_in, h)
    wb1, bb1 = linear(k1, h, h)
    wb2, bb2 = linear(k2, h, h)
    w_out, b_out = linear(k3, h, d_out)
    return {"w_in": w_in, "b_in": b_in,
            "wb1": wb1, "bb1": bb1,
            "wb2": wb2, "bb2": bb2,
            "w_out": w_out, "b_out": b_out}


def residual_mlp_ref(x, p):
    """Pure-JAX f32 reference of the PyTorch forward pass (for verification)."""
    h = x @ p["w_in"] + p["b_in"]
    h = jnp.maximum(h + jnp.maximum(h @ p["wb1"] + p["bb1"], 0.0), 0.0)
    h = jnp.maximum(h + jnp.maximum(h @ p["wb2"] + p["bb2"], 0.0), 0.0)
    z = h @ p["w_out"] + p["b_out"]
    return jax.nn.softmax(z, axis=1)


if __name__ == "__main__":
    # layer_sizes = [16, 32, 32, 32, 8], block_depth = 2
    #  -> input Linear(16,32), two ResidualBlocks(width=32), output Linear(32,8)
    layer_sizes = [16, 32, 32, 32, 8]
    batch = 8

    key = jax.random.PRNGKey(0)
    kx, kp = jax.random.split(key)
    x = jax.random.normal(kx, (batch, layer_sizes[0]), jnp.float32)
    params = init_params(kp, layer_sizes)

    out = jax.block_until_ready(residual_mlp(x, params))
    ref = residual_mlp_ref(x, params)

    assert out.shape == (batch, layer_sizes[-1])
    assert bool(jnp.all(jnp.isfinite(out)))
    # bf16 matmul operands (f32 accumulation) -> relaxed tolerance vs f32 ref.
    assert jnp.allclose(out, ref, atol=2e-2, rtol=2e-2), float(jnp.max(jnp.abs(out - ref)))
    # Exact reciprocal -> softmax rows normalize to 1 within f32 rounding.
    assert jnp.allclose(jnp.sum(out, axis=1), 1.0, atol=1e-3)

    print("KERNEL_OK")
</pallas_src>

<mosaic_0001>
module attributes {stable_mosaic.version = 11 : i64} {
  func.func @residual_mlp_kernel(%arg0: i32, %arg1: memref<8x128xbf16, #tpu.memory_space<vmem>>, %arg2: memref<128x128xbf16, #tpu.memory_space<vmem>>, %arg3: memref<1x128xf32, #tpu.memory_space<vmem>>, %arg4: memref<128x128xbf16, #tpu.memory_space<vmem>>, %arg5: memref<1x128xf32, #tpu.memory_space<vmem>>, %arg6: memref<128x128xbf16, #tpu.memory_space<vmem>>, %arg7: memref<1x128xf32, #tpu.memory_space<vmem>>, %arg8: memref<128x128xbf16, #tpu.memory_space<vmem>>, %arg9: memref<1x128xf32, #tpu.memory_space<vmem>>, %arg10: memref<8x128xf32, #tpu.memory_space<vmem>>) attributes {dimension_semantics = [#tpu.dimension_semantics<parallel>], iteration_bounds = array<i64: 1>, scalar_prefetch = 0 : i64, scratch_operands = 0 : i64, tpu.core_type = #tpu.core_type<tc>, window_params = [{transform_indices = @transform_0, window_bounds = array<i64: 8, 128>}, {pipeline_mode = #tpu.pipeline_mode<synchronous>, transform_indices = @transform_1, window_bounds = array<i64: 128, 128>}, {pipeline_mode = #tpu.pipeline_mode<synchronous>, transform_indices = @transform_2, window_bounds = array<i64: 1, 128>}, {pipeline_mode = #tpu.pipeline_mode<synchronous>, transform_indices = @transform_3, window_bounds = array<i64: 128, 128>}, {pipeline_mode = #tpu.pipeline_mode<synchronous>, transform_indices = @transform_4, window_bounds = array<i64: 1, 128>}, {pipeline_mode = #tpu.pipeline_mode<synchronous>, transform_indices = @transform_5, window_bounds = array<i64: 128, 128>}, {pipeline_mode = #tpu.pipeline_mode<synchronous>, transform_indices = @transform_6, window_bounds = array<i64: 1, 128>}, {pipeline_mode = #tpu.pipeline_mode<synchronous>, transform_indices = @transform_7, window_bounds = array<i64: 128, 128>}, {pipeline_mode = #tpu.pipeline_mode<synchronous>, transform_indices = @transform_8, window_bounds = array<i64: 1, 128>}, {transform_indices = @transform_9, window_bounds = array<i64: 8, 128>}]} {
    %c0 = arith.constant 0 : index
    %c0_0 = arith.constant 0 : index
    %0 = vector.load %arg1[%c0, %c0_0] : memref<8x128xbf16, #tpu.memory_space<vmem>>, vector<8x128xbf16>
    %c0_1 = arith.constant 0 : index
    %c0_2 = arith.constant 0 : index
    %1 = vector.load %arg2[%c0_1, %c0_2] : memref<128x128xbf16, #tpu.memory_space<vmem>>, vector<128x128xbf16>
    %cst = arith.constant dense<0.000000e+00> : vector<8x128xf32>
    %2 = tpu.matmul %0, %1, %cst {dimension_numbers = #tpu.dot_dimension_numbers<[1], [0], [0], [1], [0, 0, 1, 1], [], []>} : vector<8x128xbf16>, vector<128x128xbf16>, vector<8x128xf32> -> vector<8x128xf32>
    %c0_3 = arith.constant 0 : index
    %c0_4 = arith.constant 0 : index
    %3 = vector.load %arg3[%c0_3, %c0_4] : memref<1x128xf32, #tpu.memory_space<vmem>>, vector<1x128xf32>
    %4 = vector.broadcast %3 : vector<1x128xf32> to vector<8x128xf32>
    %5 = arith.addf %2, %4 : vector<8x128xf32>
    %6 = arith.truncf %5 : vector<8x128xf32> to vector<8x128xbf16>
    %c0_5 = arith.constant 0 : index
    %c0_6 = arith.constant 0 : index
    %7 = vector.load %arg4[%c0_5, %c0_6] : memref<128x128xbf16, #tpu.memory_space<vmem>>, vector<128x128xbf16>
    %cst_7 = arith.constant dense<0.000000e+00> : vector<8x128xf32>
    %8 = tpu.matmul %6, %7, %cst_7 {dimension_numbers = #tpu.dot_dimension_numbers<[1], [0], [0], [1], [0, 0, 1, 1], [], []>} : vector<8x128xbf16>, vector<128x128xbf16>, vector<8x128xf32> -> vector<8x128xf32>
    %c0_8 = arith.constant 0 : index
    %c0_9 = arith.constant 0 : index
    %9 = vector.load %arg5[%c0_8, %c0_9] : memref<1x128xf32, #tpu.memory_space<vmem>>, vector<1x128xf32>
    %10 = vector.broadcast %9 : vector<1x128xf32> to vector<8x128xf32>
    %11 = arith.addf %8, %10 : vector<8x128xf32>
    %cst_10 = arith.constant 0.000000e+00 : f32
    %12 = vector.broadcast %cst_10 : f32 to vector<8x128xf32>
    %13 = arith.maximumf %11, %12 : vector<8x128xf32>
    %14 = arith.addf %5, %13 : vector<8x128xf32>
    %cst_11 = arith.constant 0.000000e+00 : f32
    %15 = vector.broadcast %cst_11 : f32 to vector<8x128xf32>
    %16 = arith.maximumf %14, %15 : vector<8x128xf32>
    %17 = arith.truncf %16 : vector<8x128xf32> to vector<8x128xbf16>
    %c0_12 = arith.constant 0 : index
    %c0_13 = arith.constant 0 : index
    %18 = vector.load %arg6[%c0_12, %c0_13] : memref<128x128xbf16, #tpu.memory_space<vmem>>, vector<128x128xbf16>
    %cst_14 = arith.constant dense<0.000000e+00> : vector<8x128xf32>
    %19 = tpu.matmul %17, %18, %cst_14 {dimension_numbers = #tpu.dot_dimension_numbers<[1], [0], [0], [1], [0, 0, 1, 1], [], []>} : vector<8x128xbf16>, vector<128x128xbf16>, vector<8x128xf32> -> vector<8x128xf32>
    %c0_15 = arith.constant 0 : index
    %c0_16 = arith.constant 0 : index
    %20 = vector.load %arg7[%c0_15, %c0_16] : memref<1x128xf32, #tpu.memory_space<vmem>>, vector<1x128xf32>
    %21 = vector.broadcast %20 : vector<1x128xf32> to vector<8x128xf32>
    %22 = arith.addf %19, %21 : vector<8x128xf32>
    %cst_17 = arith.constant 0.000000e+00 : f32
    %23 = vector.broadcast %cst_17 : f32 to vector<8x128xf32>
    %24 = arith.maximumf %22, %23 : vector<8x128xf32>
    %25 = arith.addf %16, %24 : vector<8x128xf32>
    %cst_18 = arith.constant 0.000000e+00 : f32
    %26 = vector.broadcast %cst_18 : f32 to vector<8x128xf32>
    %27 = arith.maximumf %25, %26 : vector<8x128xf32>
    %28 = arith.truncf %27 : vector<8x128xf32> to vector<8x128xbf16>
    %c0_19 = arith.constant 0 : index
    %c0_20 = arith.constant 0 : index
    %29 = vector.load %arg8[%c0_19, %c0_20] : memref<128x128xbf16, #tpu.memory_space<vmem>>, vector<128x128xbf16>
    %cst_21 = arith.constant dense<0.000000e+00> : vector<8x128xf32>
    %30 = tpu.matmul %28, %29, %cst_21 {dimension_numbers = #tpu.dot_dimension_numbers<[1], [0], [0], [1], [0, 0, 1, 1], [], []>} : vector<8x128xbf16>, vector<128x128xbf16>, vector<8x128xf32> -> vector<8x128xf32>
    %c0_22 = arith.constant 0 : index
    %c0_23 = arith.constant 0 : index
    %31 = vector.load %arg9[%c0_22, %c0_23] : memref<1x128xf32, #tpu.memory_space<vmem>>, vector<1x128xf32>
    %32 = vector.broadcast %31 : vector<1x128xf32> to vector<8x128xf32>
    %33 = arith.addf %30, %32 : vector<8x128xf32>
    %cst_24 = arith.constant dense<0xFF800000> : vector<8xf32>
    %34 = vector.multi_reduction <maximumf>, %33, %cst_24 [1] : vector<8x128xf32> to vector<8xf32>
    %35 = vector.shape_cast %34 : vector<8xf32> to vector<8x1xf32>
    %36 = vector.broadcast %35 : vector<8x1xf32> to vector<8x128xf32>
    %37 = arith.subf %33, %36 : vector<8x128xf32>
    %38 = math.exp %37 : vector<8x128xf32>
    %cst_25 = arith.constant dense<0.000000e+00> : vector<8xf32>
    %39 = vector.multi_reduction <add>, %38, %cst_25 [1] : vector<8x128xf32> to vector<8xf32>
    %40 = vector.shape_cast %39 : vector<8xf32> to vector<8x1xf32>
    %41 = tpu.reciprocal %40 : vector<8x1xf32> -> vector<8x1xf32>
    %42 = vector.broadcast %41 : vector<8x1xf32> to vector<8x128xf32>
    %43 = arith.mulf %38, %42 : vector<8x128xf32>
    %c0_26 = arith.constant 0 : index
    %c0_27 = arith.constant 0 : index
    %44 = vector.load %arg10[%c0_26, %c0_27] : memref<8x128xf32, #tpu.memory_space<vmem>>, vector<8x128xf32>
    tpu.vector_store %arg10[%c0_26, %c0_27], %43 {strides = array<i32>} : memref<8x128xf32, #tpu.memory_space<vmem>>, vector<8x128xf32>,
    return
  }
  func.func @transform_0(%arg0: i32) -> (i32, i32) {
    %c0_i32 = arith.constant 0 : i32
    %c0_i32_0 = arith.constant 0 : i32
    return %arg0, %c0_i32 : i32, i32
  }
  func.func @transform_1(%arg0: i32) -> (i32, i32) {
    %c0_i32 = arith.constant 0 : i32
    %c0_i32_0 = arith.constant 0 : i32
    %c0_i32_1 = arith.constant 0 : i32
    return %c0_i32, %c0_i32_0 : i32, i32
  }
  func.func @transform_2(%arg0: i32) -> (i32, i32) {
    %c0_i32 = arith.constant 0 : i32
    %c0_i32_0 = arith.constant 0 : i32
    %c0_i32_1 = arith.constant 0 : i32
    return %c0_i32, %c0_i32_0 : i32, i32
  }
  func.func @transform_3(%arg0: i32) -> (i32, i32) {
    %c0_i32 = arith.constant 0 : i32
    %c0_i32_0 = arith.constant 0 : i32
    %c0_i32_1 = arith.constant 0 : i32
    return %c0_i32, %c0_i32_0 : i32, i32
  }
  func.func @transform_4(%arg0: i32) -> (i32, i32) {
    %c0_i32 = arith.constant 0 : i32
    %c0_i32_0 = arith.constant 0 : i32
    %c0_i32_1 = arith.constant 0 : i32
    return %c0_i32, %c0_i32_0 : i32, i32
  }
  func.func @transform_5(%arg0: i32) -> (i32, i32) {
    %c0_i32 = arith.constant 0 : i32
    %c0_i32_0 = arith.constant 0 : i32
    %c0_i32_1 = arith.constant 0 : i32
    return %c0_i32, %c0_i32_0 : i32, i32
  }
  func.func @transform_6(%arg0: i32) -> (i32, i32) {
    %c0_i32 = arith.constant 0 : i32
    %c0_i32_0 = arith.constant 0 : i32
    %c0_i32_1 = arith.constant 0 : i32
    return %c0_i32, %c0_i32_0 : i32, i32
  }
  func.func @transform_7(%arg0: i32) -> (i32, i32) {
    %c0_i32 = arith.constant 0 : i32
    %c0_i32_0 = arith.constant 0 : i32
    %c0_i32_1 = arith.constant 0 : i32
    return %c0_i32, %c0_i32_0 : i32, i32
  }
  func.func @transform_8(%arg0: i32) -> (i32, i32) {
    %c0_i32 = arith.constant 0 : i32
    %c0_i32_0 = arith.constant 0 : i32
    %c0_i32_1 = arith.constant 0 : i32
    return %c0_i32, %c0_i32_0 : i32, i32
  }
  func.func @transform_9(%arg0: i32) -> (i32, i32) {
    %c0_i32 = arith.constant 0 : i32
    %c0_i32_0 = arith.constant 0 : i32
    return %arg0, %c0_i32 : i32, i32
  }
}

</mosaic_0001>

<bundles_post_ra>
// kernel: tpu_custom_call.1
= control target key start
LH: loop header
LB: loop body
LE: loop exit
PB: predicated region body
PF: predicated region fallthrough
CT: control target
= control target key end

     0   :  { %14 = vsyncpa [#allocation3], 0  ;;  %s901_s0 = inlined_call_operand.hbm [shape: bf16[8,128], index: 0, kind: input, shape index: {}]   ;;  %s902_s1 = inlined_call_operand.hbm [shape: bf16[128,128], index: 1, kind: input, shape index: {}]   ;;  %s903_s2 = inlined_call_operand.vmem [shape: f32[1,128], index: 2, kind: input, shape index: {}]   ;;  %s904_s3 = inlined_call_operand.hbm [shape: bf16[128,128], index: 3, kind: input, shape index: {}]   ;;  %s905_s4 = inlined_call_operand.vmem [shape: f32[1,128], index: 4, kind: input, shape index: {}]   ;;  %s906_s5 = inlined_call_operand.hbm [shape: bf16[128,128], index: 5, kind: input, shape index: {}]   ;;  %s907_s6 = inlined_call_operand.vmem [shape: f32[1,128], index: 6, kind: input, shape index: {}]   ;;  %s908_s7 = inlined_call_operand.hbm [shape: bf16[128,128], index: 7, kind: input, shape index: {}]   ;;  %s909_s8 = inlined_call_operand.vmem [shape: f32[1,128], index: 8, kind: input, shape index: {}]   ;;  %s910_s9 = inlined_call_operand.hbm [shape: f32[8,128], index: 9, kind: output, shape index: {}]  }
   0x1   :  { %15 = vsyncpa [#allocation6], 0 }
   0x2   :  { %16 = vsyncpa [#allocation9], 0  ;;  %s33_s11 = sshll.u32 %s902_s1, 4  ;;  %s34_s11 = int_to_ptr.hbm [resolvable:$true] %s33_s11 }
   0x3   :  { %17 = vsyncpa [#allocation4], 0  ;;  %s813_s12 = smov [#allocation5]   ;;  %s63_s16 = sshll.u32 %s906_s5, 4  ;;  %s64_s16 = int_to_ptr.hbm [resolvable:$true] %s63_s16 }
   0x4   :  { %s35_s13 = sshll.u32 %s813_s12, 4  ;;  %s814_s17 = smov 64   ;;  %s36_s13 = int_to_ptr.vmem [resolvable:$true] %s35_s13 }
   0x5   :  { %s815_s18 = smov 4   ;;  %s816_s19 = smov [#allocation8]  }
   0x6   :  { %41 = dma.hbm_to_vmem [thread:$0]  %s34_s11, 1024, %s36_s13, [#allocation6], %s814_s17, %s814_s17, %s815_s18  }
   0x7   :  { %s65_s20 = sshll.u32 %s816_s19, 4  ;;  %s23_s23 = sshll.u32 %s901_s0, 4  ;;  %s66_s20 = int_to_ptr.vmem [resolvable:$true] %s65_s20  ;;  %s24_s23 = int_to_ptr.hbm [resolvable:$true] %s23_s23 }
   0x8   :  { %71 = dma.hbm_to_vmem [thread:$0]  %s64_s16, 1024, %s66_s20, [#allocation9], %s814_s17, %s814_s17, %s815_s18  }
   0x9   :  { %s48_s25 = sshll.u32 %s904_s3, 4  ;;  %s817_s26 = smov [#allocation2]   ;;  %s49_s25 = int_to_ptr.hbm [resolvable:$true] %s48_s25 }
   0xa   :  { %s25_s27 = sshll.u32 %s817_s26, 4  ;;  %s818_s5 = smov [#allocation7]   ;;  %s26_s27 = int_to_ptr.vmem [resolvable:$true] %s25_s27 }
   0xb   :  { %28 = dma.hbm_to_vmem [thread:$0]  %s24_s23, 64, %s26_s27, [#allocation3]  }
   0xc   :  { %s50_s28 = sshll.u32 %s818_s5, 4  ;;  %s78_s10 = sshll.u32 %s908_s7, 4  ;;  %s51_s28 = int_to_ptr.vmem [resolvable:$true] %s50_s28  ;;  %s79_s10 = int_to_ptr.hbm [resolvable:$true] %s78_s10 }
   0xd   :  { %56 = dma.hbm_to_vmem [thread:$0]  %s49_s25, 1024, %s51_s28, [#allocation6], %s814_s17, %s814_s17, %s815_s18  }
   0xe   :  { %s819_s0 = smov [#allocation10]  }
   0xf   :  { %s80_s11 = sshll.u32 %s819_s0, 4  ;;  %s81_s11 = int_to_ptr.vmem [resolvable:$true] %s80_s11 }
  0x10   :  { %86 = dma.hbm_to_vmem [thread:$0]  %s79_s10, 1024, %s81_s11, [#allocation9], %s814_s17, %s814_s17, %s815_s18  }
  0x11   :  { %805 = dma.done.wait [#allocation3], 64  }
  0x12   :  { %806 = vsyncadd [#allocation3], 4294967232 }
  0x13   :  { %807 = dma.done.wait [#allocation6], 2048  }
  0x14   :  { %808 = vsyncadd [#allocation6], 4294965248 }
  0x15   :  { %809 = dma.done.wait [#allocation9], 2048  }
  0x16   :  { %810 = vsyncadd [#allocation9], 4294965248  ;;  %v620_v0 = vld [vmem:[#allocation5 + $0x38] sm:$0xff]  ;;  %v619_v1 = vld [vmem:[#allocation5 + $0x30] sm:$0xff]  ;;  %s473_s18 = sshll.u32 %s910_s9, 4  ;;  %s474_s18 = int_to_ptr.hbm [resolvable:$true] %s473_s18 }
  0x17   :  { %178 = vmatpush.bf16.msra.mxu0 %v620_v0  ;;  %v628_v2 = vld [vmem:[#allocation7 + $0x38] sm:$0xff]  ;;  %v618_v3 = vld [vmem:[#allocation5 + $0x28] sm:$0xff]  ;;  %v627_v4 = vld [vmem:[#allocation7 + $0x30] sm:$0xff] }
  0x18   :  { %260 = vmatpush.bf16.msra.mxu1 %v628_v2  ;;  %v626_v5 = vld [vmem:[#allocation7 + $0x28] sm:$0xff]  ;;  %v617_v6 = vld [vmem:[#allocation5 + $0x20] sm:$0xff]  ;;  %v616_v8 = vld [vmem:[#allocation5 + $0x18] sm:$0xff] }
  0x19   :  { %v625_v7 = vld [vmem:[#allocation7 + $0x20] sm:$0xff]  ;;  %v624_v9 = vld [vmem:[#allocation7 + $0x18] sm:$0xff]  ;;  %v615_v10 = vld [vmem:[#allocation5 + $0x10] sm:$0xff] }
  0x1a   :  { %v623_v11 = vld [vmem:[#allocation7 + $0x10] sm:$0xff]  ;;  %v614_v12 = vld [vmem:[#allocation5 + $0x8] sm:$0xff]  ;;  %v613_v14 = vld [vmem:[#allocation5] sm:$0xff] }
  0x1b   :  { %179 = vmatpush.bf16.msra.mxu0 %v619_v1  ;;  %v622_v13 = vld [vmem:[#allocation7 + $0x8] sm:$0xff]  ;;  %v109_v15 = vld [vmem:[#allocation2] sm:$0xf]  ;;  %v621_v16 = vld [vmem:[#allocation7] sm:$0xff] }
  0x1c   :  { %261 = vmatpush.bf16.msra.mxu1 %v627_v4  ;;  %v636_v17 = vld [vmem:[#allocation8 + $0x38] sm:$0xff]  ;;  %v635_v18 = vld [vmem:[#allocation8 + $0x30] sm:$0xff]  ;;  %v634_v19 = vld [vmem:[#allocation8 + $0x28] sm:$0xff] }
  0x1d   :  { %345 = vmatpush.bf16.msra.mxu2 %v636_v17  ;;  %v633_v20 = vld [vmem:[#allocation8 + $0x20] sm:$0xff]  ;;  %v632_v21 = vld [vmem:[#allocation8 + $0x18] sm:$0xff]  ;;  %v631_v27 = vld [vmem:[#allocation8 + $0x10] sm:$0xff] }
  0x1e   :  { %v653_v22 = vld [vmem:[%s903_s2] ss:$0 sm:$0xff]  ;;  %v630_v28 = vld [vmem:[#allocation8 + $0x8] sm:$0xff]  ;;  %v629_v29 = vld [vmem:[#allocation8] sm:$0xff] }
  0x1f   :  { %180 = vmatpush.bf16.msra.mxu0 %v618_v3  ;;  %v644_v30 = vld [vmem:[#allocation10 + $0x38] sm:$0xff]  ;;  %v643_v31 = vld [vmem:[#allocation10 + $0x30] sm:$0xff]  ;;  %v642_v32 = vld [vmem:[#allocation10 + $0x28] sm:$0xff] }
  0x20   :  { %262 = vmatpush.bf16.msra.mxu1 %v626_v5  ;;  %430 = vmatpush.bf16.msra.mxu3 %v644_v30  ;;  %v641_v33 = vld [vmem:[#allocation10 + $0x20] sm:$0xff]  ;;  %v640_v34 = vld [vmem:[#allocation10 + $0x18] sm:$0xff]  ;;  %v639_v43 = vld [vmem:[#allocation10 + $0x10] sm:$0xff] }
  0x21   :  { %346 = vmatpush.bf16.msra.mxu2 %v635_v18  ;;  %v654_v35 = vld [vmem:[%s905_s4] ss:$0 sm:$0xff]  ;;  %v638_v44 = vld [vmem:[#allocation10 + $0x8] sm:$0xff]  ;;  %v637_v45 = vld [vmem:[#allocation10] sm:$0xff] }
  0x22   :  { %v655_v46 = vld [vmem:[%s907_s6] ss:$0 sm:$0xff]  ;;  %s820_s6 = smov [#allocation11]  }
  0x23   :  { %181 = vmatpush.bf16.msra.mxu0 %v617_v6  ;;  %v656_v54 = vld [vmem:[%s909_s8] ss:$0 sm:$0xff]  ;;  %s471_s8 = sshll.u32 %s820_s6, 4  ;;  %s472_s8 = int_to_ptr.vmem [resolvable:$true] %s471_s8 }
  0x24   :  { %263 = vmatpush.bf16.msra.mxu1 %v625_v7  ;;  %431 = vmatpush.bf16.msra.mxu3 %v643_v31 }
  0x25   :  { %347 = vmatpush.bf16.msra.mxu2 %v634_v19 }
  0x27   :  { %182 = vmatpush.bf16.msra.mxu0 %v616_v8 }
  0x28   :  { %264 = vmatpush.bf16.msra.mxu1 %v624_v9  ;;  %432 = vmatpush.bf16.msra.mxu3 %v642_v32 }
  0x29   :  { %348 = vmatpush.bf16.msra.mxu2 %v633_v20 }
  0x2b   :  { %183 = vmatpush.bf16.msra.mxu0 %v615_v10 }
  0x2c   :  { %265 = vmatpush.bf16.msra.mxu1 %v623_v11  ;;  %433 = vmatpush.bf16.msra.mxu3 %v641_v33 }
  0x2d   :  { %349 = vmatpush.bf16.msra.mxu2 %v632_v21 }
  0x2f   :  { %184 = vmatpush.bf16.msra.mxu0 %v614_v12 }
  0x30   :  { %266 = vmatpush.bf16.msra.mxu1 %v622_v13  ;;  %434 = vmatpush.bf16.msra.mxu3 %v640_v34 }
  0x31   :  { %350 = vmatpush.bf16.msra.mxu2 %v631_v27 }
  0x33   :  { %185 = vmatpush.bf16.msra.mxu0 %v613_v14 }
  0x34   :  { %267 = vmatpush.bf16.msra.mxu1 %v621_v16  ;;  %435 = vmatpush.bf16.msra.mxu3 %v639_v43 }
  0x35   :  { %351 = vmatpush.bf16.msra.mxu2 %v630_v28 }
  0x36   :  { %186 = vmatmul.bf16.vlgmr.msra.gmra.mxu0 %v109_v15 }
  0x38   :  { %436 = vmatpush.bf16.msra.mxu3 %v638_v44 }
  0x39   :  { %352 = vmatpush.bf16.msra.mxu2 %v629_v29 }
  0x3c   :  { %437 = vmatpush.bf16.msra.mxu3 %v637_v45 }
  0xb3   :  { %v187_v23 = vpop.f32.mrf.mxu0 }
  0xb4   :  { %v188_v24 = vadd.f32 %v653_v22, %v187_v23 }
  0xb6   :  { %v191_v25 = vpack.c.bf16 %v188_v24, %v188_v24 }
  0xb8   :  { %268 = vmatmul.bf16.vlgmr.msra.gmra.mxu1 %v191_v25 }
  0xbb   :  { %v189_v26 = vpop.f32.mrf.mxu0 }
 0x135   :  { %v269_v36 = vpop.f32.mrf.mxu1 }
 0x136   :  { %v270_v37 = vadd.f32 %v654_v35, %v269_v36 }
 0x138   :  { %v273_v38 = vmax.f32 %v270_v37, 0.0 }
 0x13a   :  { %v274_v39 = vadd.f32 %v273_v38, %v188_v24 }
 0x13c   :  { %v275_v40 = vmax.f32 %v274_v39, 0.0 }
 0x13d   :  { %v271_v41 = vpop.f32.mrf.mxu1 }
 0x13e   :  { %v276_v42 = vpack.c.bf16 %v275_v40, %v275_v40 }
 0x140   :  { %353 = vmatmul.bf16.vlgmr.msra.gmra.mxu2 %v276_v42 }
 0x1c3   :  { %v354_v47 = vpop.f32.mrf.mxu2 }
 0x1c4   :  { %v355_v48 = vadd.f32 %v655_v46, %v354_v47 }
 0x1c6   :  { %v358_v49 = vmax.f32 %v355_v48, 0.0 }
 0x1c8   :  { %v359_v50 = vadd.f32 %v358_v49, %v275_v40 }
 0x1ca   :  { %v360_v51 = vmax.f32 %v359_v50, 0.0 }
 0x1cb   :  { %v356_v52 = vpop.f32.mrf.mxu2 }
 0x1cc   :  { %v361_v53 = vpack.c.bf16 %v360_v51, %v360_v51 }
 0x1ce   :  { %438 = vmatmul.bf16.vlgmr.msra.gmra.mxu3 %v361_v53 }
 0x251   :  { %v439_v55 = vpop.f32.mrf.mxu3 }
 0x252   :  { %v440_v56 = vadd.f32 %v656_v54, %v439_v55 }
 0x254   :  { %443 = vmax.xlane.f32.xlu0 %v440_v56 }
 0x259   :  { %v441_v57 = vpop.f32.mrf.mxu3 }
 0x2c7   :  { %v444_v58 = vpop.xlane.xlu0 %443 }
 0x2c8   :  { %v445_v59 = vsub.f32 %v440_v56, %v444_v58 }
 0x2ca   :  { %v446_v60 = vmul.f32 1.442695, %v445_v59 }
 0x2cc   :  { %657 = vpow2.f32 %v446_v60 }
 0x2d2   :  { %v658_v61 = vpop.eup %657 }
 0x2d3   :  { %448 = vadd.xlane.f32.xlu0 %v658_v61 }
 0x346   :  { %v449_v62 = vpop.xlane.xlu0 %448 }
 0x347   :  { %659 = vrcp.f32 %v449_v62  ;;  %v461_v2 = vand.u32 2147483648, %v449_v62  ;;  %v459_v4 = vand.u32 2147483647, %v449_v62  ;;  %vm455_vm1 = vweird.f32 %v449_v62 }
 0x349   :  { %v462_v6 = vor.u32 1.1754944e-38, %v461_v2  ;;  %vm460_vm3 = vcmp.eq.f32.partialorder %v459_v4, 8.507059e+37 }
 0x34d   :  { %v660_v63 = vpop.eup %659 }
 0x34e   :  { %v451_v0 = vmul.f32 %v660_v63, %v449_v62  ;;  %vm456_vm0 = vweird.f32 %v660_v63 }
 0x34f   :  { %vm457_vm2 = vmor %vm455_vm1, %vm456_vm0 }
 0x350   :  { %v452_v1 = vsub.f32 1.0, %v451_v0 }
 0x352   :  { %v453_v3 = vmul.f32 %v660_v63, %v452_v1 }
 0x354   :  { %v454_v5 = vadd.f32 %v660_v63, %v453_v3 }
 0x356   :  { %v458_v7 = vsel %vm457_vm2, %v660_v63, %v454_v5 }
 0x357   :  { %v463_v8 = vsel %vm460_vm3, %v462_v6, %v458_v7 }
 0x358   :  { %v464_v9 = vmul.f32 %v658_v61, %v463_v8 }
 0x35a   :  { %465 = vst [vmem:[#allocation11] sm:$0xff] %v464_v9 }
 0x35b   :  { %476 = dma.vmem_to_hbm [thread:$0]  %s472_s8, 128, %s474_s18, [#allocation4]  }
 0x35c   :  { %811 = dma.done.wait [#allocation4], 128  }
 0x35d   :  { %812 = vsyncadd [#allocation4], 4294967168 }
 0x35e   :  { %481 = vsyncpa [#allocation3], 1 }
 0x35f   :  { %482 = vsyncpa [#allocation6], 1 }
 0x360   :  { %483 = vsyncpa [#allocation9], 1 }
 0x361   :  { %484 = vsyncpa [#allocation4], 1 }

</bundles_post_ra>
